<compile_context>
chip_gen: v7x
topology: tpu7x:2x2x1
jax: 0.10.0
libtpu: 0.0.40
codegen_flags: <defaults>
</compile_context>

<pallas_src>
import math
import functools

import jax
import jax.numpy as jnp
from jax import lax
from jax.experimental import pallas as pl
from jax.experimental.pallas import tpu as pltpu

EPS = 1e-5                       # nn.LayerNorm default
COMPUTE_DTYPE = jnp.bfloat16     # MXU operand dtype / inter-layer activation dtype


def _layernorm(x, gamma, beta):
    mu = jnp.mean(x, axis=-1, keepdims=True)
    var = jnp.mean((x - mu) ** 2, axis=-1, keepdims=True)
    return (x - mu) * lax.rsqrt(var + EPS) * gamma + beta


def _weight_spec(a):
    """Full-array spec for weights/biases. Constant index map -> single-buffered."""
    nd = a.ndim
    idx = lambda b, _nd=nd: (0,) * _nd
    if hasattr(pl, "Buffered"):
        try:
            return pl.BlockSpec(a.shape, idx, pipeline_mode=pl.Buffered(1))
        except TypeError:          # older BlockSpec signature without pipeline_mode
            pass
    return pl.BlockSpec(a.shape, idx)


def _vmem_limit_bytes(request_bytes):
    """Clamp the scoped-VMEM request to the chip's physical capacity minus headroom."""
    try:
        cap = int(pltpu.get_tpu_info().vmem_capacity_bytes)
    except Exception:
        cap = 64 * 2 ** 20        # conservative: v7x per-TensorCore capacity
    headroom = 8 * 2 ** 20
    lo = 32 * 2 ** 20
    return int(min(cap - headroom, max(lo, request_bytes)))


# --------------------------------------------------------------------------------------
# TransformerBlock kernel (pre-LN MHSA + FFN, both with residuals). One batch element
# per grid step; activations (T, D); residual math in f32, bf16 at layer boundaries.
# --------------------------------------------------------------------------------------
def transformer_block_kernel(num_heads, head_dim,
                             x_ref, wqkv_ref, bqkv_ref, wo_ref, bo_ref,
                             g1_ref, b1_ref, w1_ref, bb1_ref, w2_ref, bb2_ref,
                             g2_ref, b2_ref, o_ref, heads_ref):
    f32 = jnp.float32
    cdt = wqkv_ref.dtype                      # bf16 compute dtype for MXU operands
    x = x_ref[0].astype(f32)                  # (T, D): bf16 in HBM -> f32 in-kernel math
    T, D = x.shape
    H, hd = num_heads, head_dim

    # ---------- attention branch: x + out_proj(MHSA(ln1(x))) ----------
    xn = _layernorm(x, g1_ref[0], b1_ref[0])                              # f32 (VPU)
    # 1/sqrt(hd) is already folded into the Q columns of wqkv_t / bqkv (prep time).
    qkv = jnp.dot(xn.astype(cdt), wqkv_ref[...],
                  preferred_element_type=f32) + bqkv_ref[0]               # (T, 3D) f32

    q = qkv[:, :D].astype(cdt)
    k = qkv[:, D:2 * D].astype(cdt)
    v = qkv[:, 2 * D:].astype(cdt)

    # Per-head attention: write each (T, hd) head output into its lane slice of a
    # (T, D) bf16 VMEM scratch, then do ONE K=D out-projection matmul.
    # TODO(synk): convert to lax.fori_loop / grid axis at production H/T to bound the
    # live ranges of the (T, T) score/softmax temporaries.
    for h in range(H):                        # small static loop, unrolled
        sl = slice(h * hd, (h + 1) * hd)
        qh, kh, vh = q[:, sl], k[:, sl], v[:, sl]
        # scores: contract last dims of q/k directly (no kh.T relayout)
        s = lax.dot_general(qh, kh, (((1,), (1,)), ((), ())),
                            preferred_element_type=f32)                   # (T, T) f32
        s = s - jnp.max(s, axis=-1, keepdims=True)
        p = jnp.exp(s)                                                    # EUP
        p = p * pl.reciprocal(jnp.sum(p, axis=-1, keepdims=True), approx=True)
        oh = jnp.dot(p.astype(cdt), vh, preferred_element_type=f32)       # (T, hd) f32
        heads_ref[:, sl] = oh.astype(cdt)                                 # lane-slice store

    attn = jnp.dot(heads_ref[...], wo_ref[...],
                   preferred_element_type=f32)                            # (T, D), K=D
    x1 = x + attn + bo_ref[0]

    # ---------- ffn branch: x1 + W2(relu(W1(ln2(x1)))) ----------
    # TODO(synk): slab-tile the 4D hidden reduction (stream w1/w2 slabs) for large D.
    xn2 = _layernorm(x1, g2_ref[0], b2_ref[0])
    hid = jnp.dot(xn2.astype(cdt), w1_ref[...], preferred_element_type=f32) + bb1_ref[0]
    hid = jnp.maximum(hid, 0.0)
    ff = jnp.dot(hid.astype(cdt), w2_ref[...], preferred_element_type=f32) + bb2_ref[0]

    o_ref[0] = (x1 + ff).astype(o_ref.dtype)   # bf16 layer boundary


def transformer_block(x, p, num_heads):
    B, T, D = x.shape
    head_dim = D // num_heads
    plist = [
        p["wqkv_t"], p["bqkv"], p["wo_t"], p["bo"],
        p["g1"], p["b1"], p["w1_t"], p["bb1"], p["w2_t"], p["bb2"],
        p["g2"], p["b2"],
    ]

    in_specs = [pl.BlockSpec((1, T, D), lambda b: (b, 0, 0))] + [_weight_spec(w) for w in plist]
    out_specs = pl.BlockSpec((1, T, D), lambda b: (b, 0, 0))

    # Scoped VMEM sized from the real footprint, clamped to chip capacity - headroom.
    param_bytes = sum(int(w.size) * w.dtype.itemsize for w in plist)
    act_bytes = T * (3 * D + 4 * D + 4 * D) * 4       # qkv + ffn hidden + residual temps (f32)
    score_bytes = 2 * T * T * 4                       # score/softmax temporaries (f32)
    blk_bytes = 2 * 2 * T * D * 2 + T * D * 2         # bf16 in/out blocks (x2 buf) + head scratch
    vmem_limit = _vmem_limit_bytes(2 * (param_bytes + act_bytes + score_bytes + blk_bytes))

    kernel = functools.partial(transformer_block_kernel, num_heads, head_dim)
    return pl.pallas_call(
        kernel,
        out_shape=jax.ShapeDtypeStruct((B, T, D), x.dtype),   # bf16 inter-layer activations
        grid_spec=pltpu.PrefetchScalarGridSpec(
            num_scalar_prefetch=0,
            grid=(B,),
            in_specs=in_specs,
            out_specs=out_specs,
            scratch_shapes=[pltpu.VMEM((T, D), COMPUTE_DTYPE)],   # per-head output staging
        ),
        compiler_params=pltpu.CompilerParams(
            dimension_semantics=("parallel",),     # megacore-shard batch on v7x
            vmem_limit_bytes=vmem_limit,
        ),
    )(x, *plist)


# --------------------------------------------------------------------------------------
# Head kernel: gridded over B. Mean-pool over T in-kernel (no O(B^2*T) pool matrix),
# fc (bf16 MXU, f32 acc) and L2 normalization.
# --------------------------------------------------------------------------------------
def encoder_head_kernel(inv_t, x_ref, w_ref, b_ref, o_ref):
    f32 = jnp.float32
    x = x_ref[0].astype(f32)                                       # (T, D)
    pooled = jnp.sum(x, axis=0, keepdims=True) * inv_t             # (1, D) mean over T
    y = jnp.dot(pooled.astype(w_ref.dtype), w_ref[...],
                preferred_element_type=f32) + b_ref[...]           # (1, D)
    ss = jnp.sum(y * y, axis=-1, keepdims=True)
    o_ref[0] = y * lax.rsqrt(jnp.maximum(ss, 1e-24))


def encoder_head(x, wfc_t, bfc):
    B, T, D = x.shape
    req = 4 * (wfc_t.size * wfc_t.dtype.itemsize + bfc.size * 4 + 4 * T * D * 2)
    out = pl.pallas_call(
        functools.partial(encoder_head_kernel, 1.0 / T),
        out_shape=jax.ShapeDtypeStruct((B, 1, D), jnp.float32),
        grid_spec=pltpu.PrefetchScalarGridSpec(
            num_scalar_prefetch=0,
            grid=(B,),
            in_specs=[pl.BlockSpec((1, T, D), lambda b: (b, 0, 0)),
                      _weight_spec(wfc_t), _weight_spec(bfc)],
            out_specs=pl.BlockSpec((1, 1, D), lambda b: (b, 0, 0)),
        ),
        compiler_params=pltpu.CompilerParams(
            dimension_semantics=("parallel",),
            vmem_limit_bytes=_vmem_limit_bytes(req),
        ),
    )(x, wfc_t, bfc)
    return out[:, 0, :]


# --------------------------------------------------------------------------------------
# Full encoder forward (Pallas path consumes prepped params).
# --------------------------------------------------------------------------------------
def transformer_text_encoder(captions, params, num_heads):
    emb = params["embedding"]
    D = emb.shape[1]
    B, T = captions.shape
    # Embedding gather + positional encoding left to XLA (data-dependent gather).
    x = jnp.take(emb, captions, axis=0) * math.sqrt(D) + params["pos_enc"][None, :T, :]
    x = x.astype(COMPUTE_DTYPE)                  # bf16 residual stream between layers
    for lp in params["layers"]:
        x = transformer_block(x, lp, num_heads)
    return encoder_head(x, params["wfc_t"], params["bfc"])


# --------------------------------------------------------------------------------------
# Raw torch-style parameters (f32, torch (out, in) layouts) and kernel-ready prepping
# (transpose to (in, out), fold 1/sqrt(hd) into Q, cast to bf16). Prep is one-time host
# preprocessing, not a per-call wrapper op.
# --------------------------------------------------------------------------------------
def make_params(key, vocab_size, embed_dim, num_heads, num_layers, max_len):
    del num_heads
    D = embed_dim
    std = 0.02
    keys = jax.random.split(key, num_layers + 3)

    emb = jax.random.normal(keys[0], (vocab_size, D), jnp.float32)
    emb = emb.at[0].set(0.0)                               # padding_idx=0

    pos = jnp.arange(max_len, dtype=jnp.float32)[:, None]
    div = jnp.exp(jnp.arange(0, D, 2, dtype=jnp.float32) * (-math.log(10000.0) / D))
    pe = jnp.zeros((max_len, D), jnp.float32)
    pe = pe.at[:, 0::2].set(jnp.sin(pos * div))
    pe = pe.at[:, 1::2].set(jnp.cos(pos * div))

    layers = []
    for l in range(num_layers):
        ks = jax.random.split(keys[1 + l], 8)
        layers.append({
            "wqkv": jax.random.normal(ks[0], (3 * D, D), jnp.float32) * std,   # (out, in)
            "bqkv": jax.random.normal(ks[1], (3 * D,), jnp.float32) * std,
            "wo":   jax.random.normal(ks[2], (D, D), jnp.float32) * std,
            "bo":   jax.random.normal(ks[3], (D,), jnp.float32) * std,
            "w1":   jax.random.normal(ks[4], (4 * D, D), jnp.float32) * std,
            "b1":   jax.random.normal(ks[5], (4 * D,), jnp.float32) * std,
            "w2":   jax.random.normal(ks[6], (D, 4 * D), jnp.float32) * std,
            "b2":   jax.random.normal(ks[7], (D,), jnp.float32) * std,
            "ln1_g": jnp.ones((D,), jnp.float32), "ln1_b": jnp.zeros((D,), jnp.float32),
            "ln2_g": jnp.ones((D,), jnp.float32), "ln2_b": jnp.zeros((D,), jnp.float32),
        })

    wfc = jax.random.normal(keys[-2], (D, D), jnp.float32) * std
    bfc = jax.random.normal(keys[-1], (D,), jnp.float32) * std
    return {"embedding": emb, "pos_enc": pe, "layers": layers, "wfc": wfc, "bfc": bfc}


def prep_params(raw, num_heads, compute_dtype=COMPUTE_DTYPE):
    D = raw["embedding"].shape[1]
    hd = D // num_heads
    scale = 1.0 / math.sqrt(hd)
    layers = []
    for lp in raw["layers"]:
        wqkv = lp["wqkv"].at[:D].multiply(scale)     # fold 1/sqrt(hd) into Q rows
        bqkv = lp["bqkv"].at[:D].multiply(scale)
        layers.append({
            "wqkv_t": wqkv.T.astype(compute_dtype),            # (D, 3D)
            "bqkv": bqkv[None, :],
            "wo_t": lp["wo"].T.astype(compute_dtype),           # (D, D)
            "bo": lp["bo"][None, :],
            "w1_t": lp["w1"].T.astype(compute_dtype),           # (D, 4D)
            "bb1": lp["b1"][None, :],
            "w2_t": lp["w2"].T.astype(compute_dtype),           # (4D, D)
            "bb2": lp["b2"][None, :],
            "g1": lp["ln1_g"][None, :], "b1": lp["ln1_b"][None, :],
            "g2": lp["ln2_g"][None, :], "b2": lp["ln2_b"][None, :],
        })
    return {
        "embedding": raw["embedding"], "pos_enc": raw["pos_enc"], "layers": layers,
        "wfc_t": raw["wfc"].T.astype(compute_dtype), "bfc": raw["bfc"][None, :],
    }


# --------------------------------------------------------------------------------------
# Pure-JAX f32 reference mirroring the PyTorch forward (consumes raw torch-style params).
# --------------------------------------------------------------------------------------
def reference_block(x, p, num_heads):
    B, T, D = x.shape
    hd = D // num_heads

    def ln(t, g, b):
        mu = jnp.mean(t, axis=-1, keepdims=True)
        var = jnp.mean((t - mu) ** 2, axis=-1, keepdims=True)
        return (t - mu) / jnp.sqrt(var + EPS) * g + b

    xn = ln(x, p["ln1_g"], p["ln1_b"])
    qkv = xn @ p["wqkv"].T + p["bqkv"]
    qkv = qkv.reshape(B, T, 3, num_heads, hd).transpose(2, 0, 3, 1, 4)
    q, k, v = qkv[0], qkv[1], qkv[2]                                   # (B, H, T, hd)
    s = jnp.einsum("bhqd,bhkd->bhqk", q, k) / math.sqrt(hd)
    pw = jax.nn.softmax(s, axis=-1)
    o = jnp.einsum("bhqk,bhkd->bhqd", pw, v).transpose(0, 2, 1, 3).reshape(B, T, D)
    x1 = x + o @ p["wo"].T + p["bo"]
    xn2 = ln(x1, p["ln2_g"], p["ln2_b"])
    h = jnp.maximum(xn2 @ p["w1"].T + p["b1"], 0.0)
    return x1 + h @ p["w2"].T + p["b2"]


def reference_encoder(captions, raw, num_heads):
    emb = raw["embedding"]
    D = emb.shape[1]
    T = captions.shape[1]
    x = emb[captions] * math.sqrt(D) + raw["pos_enc"][None, :T, :]
    for lp in raw["layers"]:
        x = reference_block(x, lp, num_heads)
    pooled = x.mean(axis=1)
    y = pooled @ raw["wfc"].T + raw["bfc"]
    n = jnp.maximum(jnp.linalg.norm(y, axis=-1, keepdims=True), 1e-12)
    return y / n


if __name__ == "__main__":
    B, T = 2, 8
    VOCAB, D, H, L, MAX_LEN = 32, 32, 4, 2, 16

    key = jax.random.PRNGKey(0)
    kc, kp = jax.random.split(key)
    captions = jax.random.randint(kc, (B, T), 0, VOCAB)
    captions = captions.at[:, -1].set(0)      # exercise padding_idx row
    raw_params = make_params(kp, VOCAB, D, H, L, MAX_LEN)
    params = prep_params(raw_params, H)

    out = jax.block_until_ready(transformer_text_encoder(captions, params, H))
    ref = jax.block_until_ready(reference_encoder(captions, raw_params, H))

    assert out.shape == (B, D)
    err = float(jnp.max(jnp.abs(out - ref)))
    assert err < 2e-2, f"max abs err = {err}"
    norms = jnp.linalg.norm(out, axis=-1)
    assert jnp.allclose(norms, 1.0, atol=1e-3), f"norms = {norms}"
    print("KERNEL_OK")
</pallas_src>

<mosaic_0001>
module attributes {stable_mosaic.version = 11 : i64} {
  func.func @transformer_block_kernel(%arg0: i32, %arg1: memref<1x8x32xbf16, #tpu.memory_space<vmem>>, %arg2: memref<32x96xbf16, #tpu.memory_space<vmem>>, %arg3: memref<1x96xf32, #tpu.memory_space<vmem>>, %arg4: memref<32x32xbf16, #tpu.memory_space<vmem>>, %arg5: memref<1x32xf32, #tpu.memory_space<vmem>>, %arg6: memref<1x32xf32, #tpu.memory_space<vmem>>, %arg7: memref<1x32xf32, #tpu.memory_space<vmem>>, %arg8: memref<32x128xbf16, #tpu.memory_space<vmem>>, %arg9: memref<1x128xf32, #tpu.memory_space<vmem>>, %arg10: memref<128x32xbf16, #tpu.memory_space<vmem>>, %arg11: memref<1x32xf32, #tpu.memory_space<vmem>>, %arg12: memref<1x32xf32, #tpu.memory_space<vmem>>, %arg13: memref<1x32xf32, #tpu.memory_space<vmem>>, %arg14: memref<1x8x32xbf16, #tpu.memory_space<vmem>>, %arg15: memref<8x32xbf16, #tpu.memory_space<vmem>>) attributes {dimension_semantics = [#tpu.dimension_semantics<parallel>], iteration_bounds = array<i64: 2>, scalar_prefetch = 0 : i64, scratch_operands = 1 : i64, tpu.core_type = #tpu.core_type<tc>, window_params = [{transform_indices = @transform_0, window_bounds = array<i64: 1, 8, 32>}, {pipeline_mode = #tpu.pipeline_mode<synchronous>, transform_indices = @transform_1, window_bounds = array<i64: 32, 96>}, {pipeline_mode = #tpu.pipeline_mode<synchronous>, transform_indices = @transform_2, window_bounds = array<i64: 1, 96>}, {pipeline_mode = #tpu.pipeline_mode<synchronous>, transform_indices = @transform_3, window_bounds = array<i64: 32, 32>}, {pipeline_mode = #tpu.pipeline_mode<synchronous>, transform_indices = @transform_4, window_bounds = array<i64: 1, 32>}, {pipeline_mode = #tpu.pipeline_mode<synchronous>, transform_indices = @transform_5, window_bounds = array<i64: 1, 32>}, {pipeline_mode = #tpu.pipeline_mode<synchronous>, transform_indices = @transform_6, window_bounds = array<i64: 1, 32>}, {pipeline_mode = #tpu.pipeline_mode<synchronous>, transform_indices = @transform_7, window_bounds = array<i64: 32, 128>}, {pipeline_mode = #tpu.pipeline_mode<synchronous>, transform_indices = @transform_8, window_bounds = array<i64: 1, 128>}, {pipeline_mode = #tpu.pipeline_mode<synchronous>, transform_indices = @transform_9, window_bounds = array<i64: 128, 32>}, {pipeline_mode = #tpu.pipeline_mode<synchronous>, transform_indices = @transform_10, window_bounds = array<i64: 1, 32>}, {pipeline_mode = #tpu.pipeline_mode<synchronous>, transform_indices = @transform_11, window_bounds = array<i64: 1, 32>}, {pipeline_mode = #tpu.pipeline_mode<synchronous>, transform_indices = @transform_12, window_bounds = array<i64: 1, 32>}, {transform_indices = @transform_13, window_bounds = array<i64: 1, 8, 32>}]} {
    %c0 = arith.constant 0 : index
    %c0_0 = arith.constant 0 : index
    %c0_1 = arith.constant 0 : index
    %0 = vector.load %arg1[%c0, %c0_0, %c0_1] : memref<1x8x32xbf16, #tpu.memory_space<vmem>>, vector<1x8x32xbf16>
    %1 = vector.shape_cast %0 : vector<1x8x32xbf16> to vector<8x32xbf16>
    %2 = arith.extf %1 : vector<8x32xbf16> to vector<8x32xf32>
    %c0_2 = arith.constant 0 : index
    %c0_3 = arith.constant 0 : index
    %3 = vector.load %arg6[%c0_2, %c0_3] : memref<1x32xf32, #tpu.memory_space<vmem>>, vector<1x32xf32>
    %4 = vector.shape_cast %3 : vector<1x32xf32> to vector<32xf32>
    %c0_4 = arith.constant 0 : index
    %c0_5 = arith.constant 0 : index
    %5 = vector.load %arg7[%c0_4, %c0_5] : memref<1x32xf32, #tpu.memory_space<vmem>>, vector<1x32xf32>
    %6 = vector.shape_cast %5 : vector<1x32xf32> to vector<32xf32>
    %cst = arith.constant dense<0.000000e+00> : vector<8xf32>
    %7 = vector.multi_reduction <add>, %2, %cst [1] : vector<8x32xf32> to vector<8xf32>
    %8 = vector.shape_cast %7 : vector<8xf32> to vector<8x1xf32>
    %cst_6 = arith.constant 3.200000e+01 : f32
    %9 = vector.broadcast %cst_6 : f32 to vector<8x1xf32>
    %10 = arith.divf %8, %9 : vector<8x1xf32>
    %11 = vector.broadcast %10 : vector<8x1xf32> to vector<8x32xf32>
    %12 = arith.subf %2, %11 : vector<8x32xf32>
    %13 = arith.mulf %12, %12 : vector<8x32xf32>
    %cst_7 = arith.constant dense<0.000000e+00> : vector<8xf32>
    %14 = vector.multi_reduction <add>, %13, %cst_7 [1] : vector<8x32xf32> to vector<8xf32>
    %15 = vector.shape_cast %14 : vector<8xf32> to vector<8x1xf32>
    %cst_8 = arith.constant 3.200000e+01 : f32
    %16 = vector.broadcast %cst_8 : f32 to vector<8x1xf32>
    %17 = arith.divf %15, %16 : vector<8x1xf32>
    %18 = vector.broadcast %10 : vector<8x1xf32> to vector<8x32xf32>
    %19 = arith.subf %2, %18 : vector<8x32xf32>
    %cst_9 = arith.constant 9.99999974E-6 : f32
    %20 = vector.broadcast %cst_9 : f32 to vector<8x1xf32>
    %21 = arith.addf %17, %20 : vector<8x1xf32>
    %22 = math.rsqrt %21 : vector<8x1xf32>
    %23 = vector.broadcast %22 : vector<8x1xf32> to vector<8x32xf32>
    %24 = arith.mulf %19, %23 : vector<8x32xf32>
    %25 = vector.shape_cast %4 : vector<32xf32> to vector<1x32xf32>
    %26 = vector.broadcast %25 : vector<1x32xf32> to vector<8x32xf32>
    %27 = arith.mulf %24, %26 : vector<8x32xf32>
    %28 = vector.shape_cast %6 : vector<32xf32> to vector<1x32xf32>
    %29 = vector.broadcast %28 : vector<1x32xf32> to vector<8x32xf32>
    %30 = arith.addf %27, %29 : vector<8x32xf32>
    %31 = arith.truncf %30 : vector<8x32xf32> to vector<8x32xbf16>
    %c0_10 = arith.constant 0 : index
    %c0_11 = arith.constant 0 : index
    %32 = vector.load %arg2[%c0_10, %c0_11] : memref<32x96xbf16, #tpu.memory_space<vmem>>, vector<32x96xbf16>
    %cst_12 = arith.constant dense<0.000000e+00> : vector<8x96xf32>
    %33 = tpu.matmul %31, %32, %cst_12 {dimension_numbers = #tpu.dot_dimension_numbers<[1], [0], [0], [1], [0, 0, 1, 1], [], []>} : vector<8x32xbf16>, vector<32x96xbf16>, vector<8x96xf32> -> vector<8x96xf32>
    %c0_13 = arith.constant 0 : index
    %c0_14 = arith.constant 0 : index
    %34 = vector.load %arg3[%c0_13, %c0_14] : memref<1x96xf32, #tpu.memory_space<vmem>>, vector<1x96xf32>
    %35 = vector.shape_cast %34 : vector<1x96xf32> to vector<96xf32>
    %36 = vector.shape_cast %35 : vector<96xf32> to vector<1x96xf32>
    %37 = vector.broadcast %36 : vector<1x96xf32> to vector<8x96xf32>
    %38 = arith.addf %33, %37 : vector<8x96xf32>
    %39 = vector.extract_strided_slice %38 {offsets = [0, 0], sizes = [8, 32], strides = [1, 1]} : vector<8x96xf32> to vector<8x32xf32>
    %40 = arith.truncf %39 : vector<8x32xf32> to vector<8x32xbf16>
    %41 = vector.extract_strided_slice %38 {offsets = [0, 32], sizes = [8, 32], strides = [1, 1]} : vector<8x96xf32> to vector<8x32xf32>
    %42 = arith.truncf %41 : vector<8x32xf32> to vector<8x32xbf16>
    %43 = vector.extract_strided_slice %38 {offsets = [0, 64], sizes = [8, 32], strides = [1, 1]} : vector<8x96xf32> to vector<8x32xf32>
    %44 = arith.truncf %43 : vector<8x32xf32> to vector<8x32xbf16>
    %45 = vector.extract_strided_slice %40 {offsets = [0, 0], sizes = [8, 8], strides = [1, 1]} : vector<8x32xbf16> to vector<8x8xbf16>
    %46 = vector.extract_strided_slice %42 {offsets = [0, 0], sizes = [8, 8], strides = [1, 1]} : vector<8x32xbf16> to vector<8x8xbf16>
    %47 = vector.extract_strided_slice %44 {offsets = [0, 0], sizes = [8, 8], strides = [1, 1]} : vector<8x32xbf16> to vector<8x8xbf16>
    %cst_15 = arith.constant dense<0.000000e+00> : vector<8x8xf32>
    %48 = tpu.matmul %45, %46, %cst_15 {dimension_numbers = #tpu.dot_dimension_numbers<[1], [1], [0], [0], [0, 0, 1, 0], [], []>} : vector<8x8xbf16>, vector<8x8xbf16>, vector<8x8xf32> -> vector<8x8xf32>
    %cst_16 = arith.constant dense<0xFF800000> : vector<8xf32>
    %49 = vector.multi_reduction <maximumf>, %48, %cst_16 [1] : vector<8x8xf32> to vector<8xf32>
    %50 = vector.shape_cast %49 : vector<8xf32> to vector<8x1xf32>
    %51 = vector.broadcast %50 : vector<8x1xf32> to vector<8x8xf32>
    %52 = arith.subf %48, %51 : vector<8x8xf32>
    %53 = math.exp %52 : vector<8x8xf32>
    %cst_17 = arith.constant dense<0.000000e+00> : vector<8xf32>
    %54 = vector.multi_reduction <add>, %53, %cst_17 [1] : vector<8x8xf32> to vector<8xf32>
    %55 = vector.shape_cast %54 : vector<8xf32> to vector<8x1xf32>
    %56 = tpu.reciprocal %55 {approx = true} : vector<8x1xf32> -> vector<8x1xf32>
    %57 = vector.broadcast %56 : vector<8x1xf32> to vector<8x8xf32>
    %58 = arith.mulf %53, %57 : vector<8x8xf32>
    %59 = arith.truncf %58 : vector<8x8xf32> to vector<8x8xbf16>
    %cst_18 = arith.constant dense<0.000000e+00> : vector<8x8xf32>
    %60 = tpu.matmul %59, %47, %cst_18 {dimension_numbers = #tpu.dot_dimension_numbers<[1], [0], [0], [1], [0, 0, 1, 1], [], []>} : vector<8x8xbf16>, vector<8x8xbf16>, vector<8x8xf32> -> vector<8x8xf32>
    %61 = arith.truncf %60 : vector<8x8xf32> to vector<8x8xbf16>
    %c0_19 = arith.constant 0 : index
    %c0_20 = arith.constant 0 : index
    %62 = vector.load %arg15[%c0_19, %c0_20] : memref<8x32xbf16, #tpu.memory_space<vmem>>, vector<8x8xbf16>
    tpu.vector_store %arg15[%c0_19, %c0_20], %61 {strides = array<i32>} : memref<8x32xbf16, #tpu.memory_space<vmem>>, vector<8x8xbf16>,
    %63 = vector.extract_strided_slice %40 {offsets = [0, 8], sizes = [8, 8], strides = [1, 1]} : vector<8x32xbf16> to vector<8x8xbf16>
    %64 = vector.extract_strided_slice %42 {offsets = [0, 8], sizes = [8, 8], strides = [1, 1]} : vector<8x32xbf16> to vector<8x8xbf16>
    %65 = vector.extract_strided_slice %44 {offsets = [0, 8], sizes = [8, 8], strides = [1, 1]} : vector<8x32xbf16> to vector<8x8xbf16>
    %cst_21 = arith.constant dense<0.000000e+00> : vector<8x8xf32>
    %66 = tpu.matmul %63, %64, %cst_21 {dimension_numbers = #tpu.dot_dimension_numbers<[1], [1], [0], [0], [0, 0, 1, 0], [], []>} : vector<8x8xbf16>, vector<8x8xbf16>, vector<8x8xf32> -> vector<8x8xf32>
    %cst_22 = arith.constant dense<0xFF800000> : vector<8xf32>
    %67 = vector.multi_reduction <maximumf>, %66, %cst_22 [1] : vector<8x8xf32> to vector<8xf32>
    %68 = vector.shape_cast %67 : vector<8xf32> to vector<8x1xf32>
    %69 = vector.broadcast %68 : vector<8x1xf32> to vector<8x8xf32>
    %70 = arith.subf %66, %69 : vector<8x8xf32>
    %71 = math.exp %70 : vector<8x8xf32>
    %cst_23 = arith.constant dense<0.000000e+00> : vector<8xf32>
    %72 = vector.multi_reduction <add>, %71, %cst_23 [1] : vector<8x8xf32> to vector<8xf32>
    %73 = vector.shape_cast %72 : vector<8xf32> to vector<8x1xf32>
    %74 = tpu.reciprocal %73 {approx = true} : vector<8x1xf32> -> vector<8x1xf32>
    %75 = vector.broadcast %74 : vector<8x1xf32> to vector<8x8xf32>
    %76 = arith.mulf %71, %75 : vector<8x8xf32>
    %77 = arith.truncf %76 : vector<8x8xf32> to vector<8x8xbf16>
    %cst_24 = arith.constant dense<0.000000e+00> : vector<8x8xf32>
    %78 = tpu.matmul %77, %65, %cst_24 {dimension_numbers = #tpu.dot_dimension_numbers<[1], [0], [0], [1], [0, 0, 1, 1], [], []>} : vector<8x8xbf16>, vector<8x8xbf16>, vector<8x8xf32> -> vector<8x8xf32>
    %79 = arith.truncf %78 : vector<8x8xf32> to vector<8x8xbf16>
    %c0_25 = arith.constant 0 : index
    %c8 = arith.constant 8 : index
    %80 = vector.load %arg15[%c0_25, %c8] : memref<8x32xbf16, #tpu.memory_space<vmem>>, vector<8x8xbf16>
    tpu.vector_store %arg15[%c0_25, %c8], %79 {strides = array<i32>} : memref<8x32xbf16, #tpu.memory_space<vmem>>, vector<8x8xbf16>,
    %81 = vector.extract_strided_slice %40 {offsets = [0, 16], sizes = [8, 8], strides = [1, 1]} : vector<8x32xbf16> to vector<8x8xbf16>
    %82 = vector.extract_strided_slice %42 {offsets = [0, 16], sizes = [8, 8], strides = [1, 1]} : vector<8x32xbf16> to vector<8x8xbf16>
    %83 = vector.extract_strided_slice %44 {offsets = [0, 16], sizes = [8, 8], strides = [1, 1]} : vector<8x32xbf16> to vector<8x8xbf16>
    %cst_26 = arith.constant dense<0.000000e+00> : vector<8x8xf32>
    %84 = tpu.matmul %81, %82, %cst_26 {dimension_numbers = #tpu.dot_dimension_numbers<[1], [1], [0], [0], [0, 0, 1, 0], [], []>} : vector<8x8xbf16>, vector<8x8xbf16>, vector<8x8xf32> -> vector<8x8xf32>
    %cst_27 = arith.constant dense<0xFF800000> : vector<8xf32>
    %85 = vector.multi_reduction <maximumf>, %84, %cst_27 [1] : vector<8x8xf32> to vector<8xf32>
    %86 = vector.shape_cast %85 : vector<8xf32> to vector<8x1xf32>
    %87 = vector.broadcast %86 : vector<8x1xf32> to vector<8x8xf32>
    %88 = arith.subf %84, %87 : vector<8x8xf32>
    %89 = math.exp %88 : vector<8x8xf32>
    %cst_28 = arith.constant dense<0.000000e+00> : vector<8xf32>
    %90 = vector.multi_reduction <add>, %89, %cst_28 [1] : vector<8x8xf32> to vector<8xf32>
    %91 = vector.shape_cast %90 : vector<8xf32> to vector<8x1xf32>
    %92 = tpu.reciprocal %91 {approx = true} : vector<8x1xf32> -> vector<8x1xf32>
    %93 = vector.broadcast %92 : vector<8x1xf32> to vector<8x8xf32>
    %94 = arith.mulf %89, %93 : vector<8x8xf32>
    %95 = arith.truncf %94 : vector<8x8xf32> to vector<8x8xbf16>
    %cst_29 = arith.constant dense<0.000000e+00> : vector<8x8xf32>
    %96 = tpu.matmul %95, %83, %cst_29 {dimension_numbers = #tpu.dot_dimension_numbers<[1], [0], [0], [1], [0, 0, 1, 1], [], []>} : vector<8x8xbf16>, vector<8x8xbf16>, vector<8x8xf32> -> vector<8x8xf32>
    %97 = arith.truncf %96 : vector<8x8xf32> to vector<8x8xbf16>
    %c0_30 = arith.constant 0 : index
    %c16 = arith.constant 16 : index
    %98 = vector.load %arg15[%c0_30, %c16] : memref<8x32xbf16, #tpu.memory_space<vmem>>, vector<8x8xbf16>
    tpu.vector_store %arg15[%c0_30, %c16], %97 {strides = array<i32>} : memref<8x32xbf16, #tpu.memory_space<vmem>>, vector<8x8xbf16>,
    %99 = vector.extract_strided_slice %40 {offsets = [0, 24], sizes = [8, 8], strides = [1, 1]} : vector<8x32xbf16> to vector<8x8xbf16>
    %100 = vector.extract_strided_slice %42 {offsets = [0, 24], sizes = [8, 8], strides = [1, 1]} : vector<8x32xbf16> to vector<8x8xbf16>
    %101 = vector.extract_strided_slice %44 {offsets = [0, 24], sizes = [8, 8], strides = [1, 1]} : vector<8x32xbf16> to vector<8x8xbf16>
    %cst_31 = arith.constant dense<0.000000e+00> : vector<8x8xf32>
    %102 = tpu.matmul %99, %100, %cst_31 {dimension_numbers = #tpu.dot_dimension_numbers<[1], [1], [0], [0], [0, 0, 1, 0], [], []>} : vector<8x8xbf16>, vector<8x8xbf16>, vector<8x8xf32> -> vector<8x8xf32>
    %cst_32 = arith.constant dense<0xFF800000> : vector<8xf32>
    %103 = vector.multi_reduction <maximumf>, %102, %cst_32 [1] : vector<8x8xf32> to vector<8xf32>
    %104 = vector.shape_cast %103 : vector<8xf32> to vector<8x1xf32>
    %105 = vector.broadcast %104 : vector<8x1xf32> to vector<8x8xf32>
    %106 = arith.subf %102, %105 : vector<8x8xf32>
    %107 = math.exp %106 : vector<8x8xf32>
    %cst_33 = arith.constant dense<0.000000e+00> : vector<8xf32>
    %108 = vector.multi_reduction <add>, %107, %cst_33 [1] : vector<8x8xf32> to vector<8xf32>
    %109 = vector.shape_cast %108 : vector<8xf32> to vector<8x1xf32>
    %110 = tpu.reciprocal %109 {approx = true} : vector<8x1xf32> -> vector<8x1xf32>
    %111 = vector.broadcast %110 : vector<8x1xf32> to vector<8x8xf32>
    %112 = arith.mulf %107, %111 : vector<8x8xf32>
    %113 = arith.truncf %112 : vector<8x8xf32> to vector<8x8xbf16>
    %cst_34 = arith.constant dense<0.000000e+00> : vector<8x8xf32>
    %114 = tpu.matmul %113, %101, %cst_34 {dimension_numbers = #tpu.dot_dimension_numbers<[1], [0], [0], [1], [0, 0, 1, 1], [], []>} : vector<8x8xbf16>, vector<8x8xbf16>, vector<8x8xf32> -> vector<8x8xf32>
    %115 = arith.truncf %114 : vector<8x8xf32> to vector<8x8xbf16>
    %c0_35 = arith.constant 0 : index
    %c24 = arith.constant 24 : index
    %116 = vector.load %arg15[%c0_35, %c24] : memref<8x32xbf16, #tpu.memory_space<vmem>>, vector<8x8xbf16>
    tpu.vector_store %arg15[%c0_35, %c24], %115 {strides = array<i32>} : memref<8x32xbf16, #tpu.memory_space<vmem>>, vector<8x8xbf16>,
    %c0_36 = arith.constant 0 : index
    %c0_37 = arith.constant 0 : index
    %117 = vector.load %arg15[%c0_36, %c0_37] : memref<8x32xbf16, #tpu.memory_space<vmem>>, vector<8x32xbf16>
    %c0_38 = arith.constant 0 : index
    %c0_39 = arith.constant 0 : index
    %118 = vector.load %arg4[%c0_38, %c0_39] : memref<32x32xbf16, #tpu.memory_space<vmem>>, vector<32x32xbf16>
    %cst_40 = arith.constant dense<0.000000e+00> : vector<8x32xf32>
    %119 = tpu.matmul %117, %118, %cst_40 {dimension_numbers = #tpu.dot_dimension_numbers<[1], [0], [0], [1], [0, 0, 1, 1], [], []>} : vector<8x32xbf16>, vector<32x32xbf16>, vector<8x32xf32> -> vector<8x32xf32>
    %120 = arith.addf %2, %119 : vector<8x32xf32>
    %c0_41 = arith.constant 0 : index
    %c0_42 = arith.constant 0 : index
    %121 = vector.load %arg5[%c0_41, %c0_42] : memref<1x32xf32, #tpu.memory_space<vmem>>, vector<1x32xf32>
    %122 = vector.shape_cast %121 : vector<1x32xf32> to vector<32xf32>
    %123 = vector.shape_cast %122 : vector<32xf32> to vector<1x32xf32>
    %124 = vector.broadcast %123 : vector<1x32xf32> to vector<8x32xf32>
    %125 = arith.addf %120, %124 : vector<8x32xf32>
    %c0_43 = arith.constant 0 : index
    %c0_44 = arith.constant 0 : index
    %126 = vector.load %arg12[%c0_43, %c0_44] : memref<1x32xf32, #tpu.memory_space<vmem>>, vector<1x32xf32>
    %127 = vector.shape_cast %126 : vector<1x32xf32> to vector<32xf32>
    %c0_45 = arith.constant 0 : index
    %c0_46 = arith.constant 0 : index
    %128 = vector.load %arg13[%c0_45, %c0_46] : memref<1x32xf32, #tpu.memory_space<vmem>>, vector<1x32xf32>
    %129 = vector.shape_cast %128 : vector<1x32xf32> to vector<32xf32>
    %cst_47 = arith.constant dense<0.000000e+00> : vector<8xf32>
    %130 = vector.multi_reduction <add>, %125, %cst_47 [1] : vector<8x32xf32> to vector<8xf32>
    %131 = vector.shape_cast %130 : vector<8xf32> to vector<8x1xf32>
    %cst_48 = arith.constant 3.200000e+01 : f32
    %132 = vector.broadcast %cst_48 : f32 to vector<8x1xf32>
    %133 = arith.divf %131, %132 : vector<8x1xf32>
    %134 = vector.broadcast %133 : vector<8x1xf32> to vector<8x32xf32>
    %135 = arith.subf %125, %134 : vector<8x32xf32>
    %136 = arith.mulf %135, %135 : vector<8x32xf32>
    %cst_49 = arith.constant dense<0.000000e+00> : vector<8xf32>
    %137 = vector.multi_reduction <add>, %136, %cst_49 [1] : vector<8x32xf32> to vector<8xf32>
    %138 = vector.shape_cast %137 : vector<8xf32> to vector<8x1xf32>
    %cst_50 = arith.constant 3.200000e+01 : f32
    %139 = vector.broadcast %cst_50 : f32 to vector<8x1xf32>
    %140 = arith.divf %138, %139 : vector<8x1xf32>
    %141 = vector.broadcast %133 : vector<8x1xf32> to vector<8x32xf32>
    %142 = arith.subf %125, %141 : vector<8x32xf32>
    %cst_51 = arith.constant 9.99999974E-6 : f32
    %143 = vector.broadcast %cst_51 : f32 to vector<8x1xf32>
    %144 = arith.addf %140, %143 : vector<8x1xf32>
    %145 = math.rsqrt %144 : vector<8x1xf32>
    %146 = vector.broadcast %145 : vector<8x1xf32> to vector<8x32xf32>
    %147 = arith.mulf %142, %146 : vector<8x32xf32>
    %148 = vector.shape_cast %127 : vector<32xf32> to vector<1x32xf32>
    %149 = vector.broadcast %148 : vector<1x32xf32> to vector<8x32xf32>
    %150 = arith.mulf %147, %149 : vector<8x32xf32>
    %151 = vector.shape_cast %129 : vector<32xf32> to vector<1x32xf32>
    %152 = vector.broadcast %151 : vector<1x32xf32> to vector<8x32xf32>
    %153 = arith.addf %150, %152 : vector<8x32xf32>
    %154 = arith.truncf %153 : vector<8x32xf32> to vector<8x32xbf16>
    %c0_52 = arith.constant 0 : index
    %c0_53 = arith.constant 0 : index
    %155 = vector.load %arg8[%c0_52, %c0_53] : memref<32x128xbf16, #tpu.memory_space<vmem>>, vector<32x128xbf16>
    %cst_54 = arith.constant dense<0.000000e+00> : vector<8x128xf32>
    %156 = tpu.matmul %154, %155, %cst_54 {dimension_numbers = #tpu.dot_dimension_numbers<[1], [0], [0], [1], [0, 0, 1, 1], [], []>} : vector<8x32xbf16>, vector<32x128xbf16>, vector<8x128xf32> -> vector<8x128xf32>
    %c0_55 = arith.constant 0 : index
    %c0_56 = arith.constant 0 : index
    %157 = vector.load %arg9[%c0_55, %c0_56] : memref<1x128xf32, #tpu.memory_space<vmem>>, vector<1x128xf32>
    %158 = vector.shape_cast %157 : vector<1x128xf32> to vector<128xf32>
    %159 = vector.shape_cast %158 : vector<128xf32> to vector<1x128xf32>
    %160 = vector.broadcast %159 : vector<1x128xf32> to vector<8x128xf32>
    %161 = arith.addf %156, %160 : vector<8x128xf32>
    %cst_57 = arith.constant 0.000000e+00 : f32
    %162 = vector.broadcast %cst_57 : f32 to vector<8x128xf32>
    %163 = arith.maximumf %161, %162 : vector<8x128xf32>
    %164 = arith.truncf %163 : vector<8x128xf32> to vector<8x128xbf16>
    %c0_58 = arith.constant 0 : index
    %c0_59 = arith.constant 0 : index
    %165 = vector.load %arg10[%c0_58, %c0_59] : memref<128x32xbf16, #tpu.memory_space<vmem>>, vector<128x32xbf16>
    %cst_60 = arith.constant dense<0.000000e+00> : vector<8x32xf32>
    %166 = tpu.matmul %164, %165, %cst_60 {dimension_numbers = #tpu.dot_dimension_numbers<[1], [0], [0], [1], [0, 0, 1, 1], [], []>} : vector<8x128xbf16>, vector<128x32xbf16>, vector<8x32xf32> -> vector<8x32xf32>
    %c0_61 = arith.constant 0 : index
    %c0_62 = arith.constant 0 : index
    %167 = vector.load %arg11[%c0_61, %c0_62] : memref<1x32xf32, #tpu.memory_space<vmem>>, vector<1x32xf32>
    %168 = vector.shape_cast %167 : vector<1x32xf32> to vector<32xf32>
    %169 = vector.shape_cast %168 : vector<32xf32> to vector<1x32xf32>
    %170 = vector.broadcast %169 : vector<1x32xf32> to vector<8x32xf32>
    %171 = arith.addf %166, %170 : vector<8x32xf32>
    %172 = arith.addf %125, %171 : vector<8x32xf32>
    %173 = arith.truncf %172 : vector<8x32xf32> to vector<8x32xbf16>
    %c0_63 = arith.constant 0 : index
    %c0_64 = arith.constant 0 : index
    %c0_65 = arith.constant 0 : index
    %174 = vector.load %arg14[%c0_63, %c0_64, %c0_65] : memref<1x8x32xbf16, #tpu.memory_space<vmem>>, vector<1x8x32xbf16>
    %175 = vector.shape_cast %174 : vector<1x8x32xbf16> to vector<8x32xbf16>
    %176 = vector.shape_cast %173 : vector<8x32xbf16> to vector<1x8x32xbf16>
    tpu.vector_store %arg14[%c0_63, %c0_64, %c0_65], %176 {strides = array<i32>} : memref<1x8x32xbf16, #tpu.memory_space<vmem>>, vector<1x8x32xbf16>,
    return
  }
  func.func @transform_0(%arg0: i32) -> (i32, i32, i32) {
    %c0_i32 = arith.constant 0 : i32
    %c0_i32_0 = arith.constant 0 : i32
    %c0_i32_1 = arith.constant 0 : i32
    return %arg0, %c0_i32, %c0_i32_0 : i32, i32, i32
  }
  func.func @transform_1(%arg0: i32) -> (i32, i32) {
    %c0_i32 = arith.constant 0 : i32
    %c0_i32_0 = arith.constant 0 : i32
    %c0_i32_1 = arith.constant 0 : i32
    return %c0_i32, %c0_i32_0 : i32, i32
  }
  func.func @transform_2(%arg0: i32) -> (i32, i32) {
    %c0_i32 = arith.constant 0 : i32
    %c0_i32_0 = arith.constant 0 : i32
    %c0_i32_1 = arith.constant 0 : i32
    return %c0_i32, %c0_i32_0 : i32, i32
  }
  func.func @transform_3(%arg0: i32) -> (i32, i32) {
    %c0_i32 = arith.constant 0 : i32
    %c0_i32_0 = arith.constant 0 : i32
    %c0_i32_1 = arith.constant 0 : i32
    return %c0_i32, %c0_i32_0 : i32, i32
  }
  func.func @transform_4(%arg0: i32) -> (i32, i32) {
    %c0_i32 = arith.constant 0 : i32
    %c0_i32_0 = arith.constant 0 : i32
    %c0_i32_1 = arith.constant 0 : i32
    return %c0_i32, %c0_i32_0 : i32, i32
  }
  func.func @transform_5(%arg0: i32) -> (i32, i32) {
    %c0_i32 = arith.constant 0 : i32
    %c0_i32_0 = arith.constant 0 : i32
    %c0_i32_1 = arith.constant 0 : i32
    return %c0_i32, %c0_i32_0 : i32, i32
  }
  func.func @transform_6(%arg0: i32) -> (i32, i32) {
    %c0_i32 = arith.constant 0 : i32
    %c0_i32_0 = arith.constant 0 : i32
    %c0_i32_1 = arith.constant 0 : i32
    return %c0_i32, %c0_i32_0 : i32, i32
  }
  func.func @transform_7(%arg0: i32) -> (i32, i32) {
    %c0_i32 = arith.constant 0 : i32
    %c0_i32_0 = arith.constant 0 : i32
    %c0_i32_1 = arith.constant 0 : i32
    return %c0_i32, %c0_i32_0 : i32, i32
  }
  func.func @transform_8(%arg0: i32) -> (i32, i32) {
    %c0_i32 = arith.constant 0 : i32
    %c0_i32_0 = arith.constant 0 : i32
    %c0_i32_1 = arith.constant 0 : i32
    return %c0_i32, %c0_i32_0 : i32, i32
  }
  func.func @transform_9(%arg0: i32) -> (i32, i32) {
    %c0_i32 = arith.constant 0 : i32
    %c0_i32_0 = arith.constant 0 : i32
    %c0_i32_1 = arith.constant 0 : i32
    return %c0_i32, %c0_i32_0 : i32, i32
  }
  func.func @transform_10(%arg0: i32) -> (i32, i32) {
    %c0_i32 = arith.constant 0 : i32
    %c0_i32_0 = arith.constant 0 : i32
    %c0_i32_1 = arith.constant 0 : i32
    return %c0_i32, %c0_i32_0 : i32, i32
  }
  func.func @transform_11(%arg0: i32) -> (i32, i32) {
    %c0_i32 = arith.constant 0 : i32
    %c0_i32_0 = arith.constant 0 : i32
    %c0_i32_1 = arith.constant 0 : i32
    return %c0_i32, %c0_i32_0 : i32, i32
  }
  func.func @transform_12(%arg0: i32) -> (i32, i32) {
    %c0_i32 = arith.constant 0 : i32
    %c0_i32_0 = arith.constant 0 : i32
    %c0_i32_1 = arith.constant 0 : i32
    return %c0_i32, %c0_i32_0 : i32, i32
  }
  func.func @transform_13(%arg0: i32) -> (i32, i32, i32) {
    %c0_i32 = arith.constant 0 : i32
    %c0_i32_0 = arith.constant 0 : i32
    %c0_i32_1 = arith.constant 0 : i32
    return %arg0, %c0_i32, %c0_i32_0 : i32, i32, i32
  }
}

</mosaic_0001>

<bundles_post_ra>
// kernel: tpu_custom_call.1
= control target key start
LH: loop header
LB: loop body
LE: loop exit
PB: predicated region body
PF: predicated region fallthrough
CT: control target
= control target key end

     0   :  { %s2046_s0 = inlined_call_operand.vmem [shape: bf16[2,8,32], index: 0, kind: input, shape index: {}]   ;;  %s2047_s1 = inlined_call_operand.vmem [shape: bf16[32,96], index: 1, kind: input, shape index: {}]   ;;  %s2048_s2 = inlined_call_operand.vmem [shape: f32[1,96], index: 2, kind: input, shape index: {}]   ;;  %s2049_s3 = inlined_call_operand.vmem [shape: bf16[32,32], index: 3, kind: input, shape index: {}]   ;;  %s2050_s4 = inlined_call_operand.vmem [shape: f32[1,32], index: 4, kind: input, shape index: {}]   ;;  %s2051_s5 = inlined_call_operand.vmem [shape: f32[1,32], index: 5, kind: input, shape index: {}]   ;;  %s2052_s6 = inlined_call_operand.vmem [shape: f32[1,32], index: 6, kind: input, shape index: {}]   ;;  %s2053_s7 = inlined_call_operand.vmem [shape: bf16[32,128], index: 7, kind: input, shape index: {}]   ;;  %s2054_s8 = inlined_call_operand.vmem [shape: f32[1,128], index: 8, kind: input, shape index: {}]   ;;  %s2055_s9 = inlined_call_operand.vmem [shape: bf16[128,32], index: 9, kind: input, shape index: {}]   ;;  %s2056_s10 = inlined_call_operand.vmem [shape: f32[1,32], index: 10, kind: input, shape index: {}]   ;;  %s2057_s11 = inlined_call_operand.vmem [shape: f32[1,32], index: 11, kind: input, shape index: {}]   ;;  %s2058_s12 = inlined_call_operand.vmem [shape: f32[1,32], index: 12, kind: input, shape index: {}]   ;;  %s2059_s13 = inlined_call_operand.hbm [shape: bf16[2,8,32], index: 13, kind: output, shape index: {}]  }
   0x1   :  { %2060 = sst [smem:[#allocation6_spill]] %s2046_s0 }
   0x2   :  { %2061 = sst [smem:[#allocation7_spill]] %s2047_s1 }
   0x3   :  { %2062 = sst [smem:[#allocation8_spill]] %s2048_s2 }
   0x4   :  { %18 = vsyncpa [#allocation4], 0 }
   0x5   :  { %20 = vsyncpa [#allocation4 + $0x1], 0  ;;  %s1779_s25 = smov 0   ;;  %s1781_s26 = smov 0  }
   0x6   :  { %s1783_s27 = smov 0   ;;  %s1785_s28 = smov 0  }
   0x7 LB: > { %s1800_s29 = sadd.s32 4294967295, %s1690_s28   ;;  %s1364_s30 = sadd.s32 4294967294, %s1690_s28   ;;  %s1690_s28 = sphi %s1785_s28, %s2071_s28   ;;  %s1686_s27 = sphi %s1783_s27, %s2070_s27   ;;  %s1682_s26 = sphi %s1781_s26, %s2069_s26   ;;  %s1678_s25 = sphi %s1779_s25, %s2068_s25  }
   0x8   : > { %s1804_s14 = sadd.s32 1, %s1690_s28   ;;  %s311_s15 = sadd.s32 1, %s1686_s27 }
   0x9   : > { %s308_s16 = ssub.s32 %s1690_s28, %s1804_s14  ;;  %p321_p0 = scmp.ne.s32.totalorder %s1686_s27, %s1682_s26 }
   0xa   : > { %p309_p1 = scmp.eq.s32.totalorder %s308_s16, 0  ;;  %p322_p2 = scmp.eq.s32.totalorder %s1800_s29, 1 }
   0xb   : > { %p327_p3 = scmp.ne.s32.totalorder %s1682_s26, %s1678_s25  ;;  %p328_p4 = scmp.eq.s32.totalorder %s1364_s30, 1 }
   0xc   : > { %s1815_s17 = scalar_select %p309_p1, %s1686_s27, %s311_s15  }
   0xd   : > { %p1817_p5 = por %p322_p2, %p321_p0  ;;  %p1821_p6 = por %p328_p4, %p327_p3 }
   0xe   : > { %p1367_p7 = scmp.ge.s32.totalorder %s1690_s28, 1  ;;  %p389_p8 = scmp.lt.s32.totalorder %s1690_s28, 3 }
  0x10   : > { %p390_p9 = pnand %p1367_p7, %p389_p8 }
  0x11   : > { %p432_p10 = scmp.lt.s32.totalorder (!%p390_p9), %s1800_s29, 1  ;;  %vm441_vm0 = vcmask (!%p390_p9), 261120   ;;  %s2065_s0 = sld [smem:[#allocation6_spill]] (!%p390_p9)  ;;  %v1692_v9 = vmov (!%p390_p9), 0.0   ;;  %vm1693_vm1 = vmmov (!%p390_p9), 0   ;;  %vm541_vm2 = vcmask (!%p390_p9), 64512  }
  0x12   : > { %393 = sbr.rel (%p390_p9) target bundleno = 2593 (0xa21), region = 72  ;;  %s2066_s1 = sld [smem:[#allocation7_spill]] (!%p390_p9)  ;;  %1447 = vmatprep.subr.bf16.mxu0 (!%p390_p9), %v1692_v9  ;;  %1451 = vmatprep.mubr.msk.bf16.mxu0 (!%p390_p9), %vm1693_vm1, %v1692_v9  ;;  %v1370_v15 = vld [vmem:[%s2051_s5] ss:$0 sm:$0xff] (!%p390_p9)  ;;  %vm605_vm3 = vcmask (!%p390_p9), 1043456   ;;  %vm650_vm4 = vcmask (!%p390_p9), 60416  }
  0x13   : > { %1467 = vmatprep.subr.bf16.mxu1 (!%p390_p9), %v1692_v9  ;;  %1469 = vmatprep.mubr.msk.bf16.mxu1 (!%p390_p9), %vm1693_vm1, %v1692_v9  ;;  %v1371_v17 = vld [vmem:[%s2052_s6] ss:$0 sm:$0xff] (!%p390_p9)  ;;  %s2067_s2 = sld [smem:[#allocation8_spill]] (!%p390_p9)  ;;  %s1694_s16 = smov (!%p390_p9), 120   ;;  %vm769_vm5 = vcmask (!%p390_p9), 126016   ;;  %vm888_vm6 = vcmask (!%p390_p9), 191616  }
  0x14   : > { %s1697_s22 = smov (!%p390_p9), 80   ;;  %s1698_s23 = smov (!%p390_p9), 112   ;;  %vm1007_vm7 = vcmask (!%p390_p9), 257216   ;;  %vm1289_vm8 = vcmask (!%p390_p9), 257024  }
  0x15   : > { %s1700_s30 = smov (!%p390_p9), 104   ;;  %s1701_s15 = smov (!%p390_p9), 64  }
  0x18   : > { %v1594_v8 = vld [vmem:[%s2066_s1] sm:$0xff] (!%p390_p9)   ;;  %v1595_v10 = vld [vmem:[%s2066_s1 + $0x8] sm:$0xff] (!%p390_p9)  }
  0x19   : > { %s433_s20 = scalar_select %p432_p10, %s1800_s29, 1  ;;  %1448 = vmatpush3.bf16.msra.mxu0 %v1594_v8  ;;  %v1372_v21 = vld [vmem:[%s2067_s2] ss:$0 sm:$0xff] }
  0x1a   : > { %1449 = vmatprep.subr.bf16.mxu0 %v1692_v9 }
  0x1b   : > { %s1369_s21 = sshll.u32 %s433_s20, 2  ;;  %s1695_s20 = smov 96  }
  0x1c   : > { %s435_s24 = scalar_lea.vmem %s2065_s0, %s1369_s21  ;;  %s1696_s21 = smov 88  }
  0x1d   : > { %v437_v0 = vld [vmem:[%s435_s24] sm:$0xf]  ;;  %1450 = vmatpush3.bf16.msra.mxu0 %v1595_v10  ;;  %s1699_s24 = smov 72  }
  0x1e   : > { %v1832_v1 = vunpack.c.l.bf16 %v437_v0  ;;  %1455 = vmatprep.subr.bf16.mxu0 %v1692_v9 }
  0x20   : > { %v442_v2 = vsel %vm441_vm0, %v1832_v1, 0.0 }
  0x21   : > { %443 = vadd.xlane.f32.xlu0 %v442_v2 }
  0xae   : > { %v444_v3 = vpop.xlane.xlu0 %443 }
  0xaf   : > { %v446_v4 = vmul.f32 0.03125, %v444_v3 }
  0xb1   : > { %v447_v5 = vsub.f32 %v1832_v1, %v446_v4 }
  0xb3   : > { %v448_v6 = vmul.f32 %v447_v5, %v447_v5 }
  0xb5   : > { %v449_v7 = vsel %vm441_vm0, %v448_v6, 0.0 }
  0xb6   : > { %450 = vadd.xlane.f32.xlu0 %v449_v7 }
 0x143   : > { %v451_v11 = vpop.xlane.xlu0 %450 }
 0x144   : > { %v452_v12 = vmul.f32 0.03125, %v451_v11 }
 0x146   : > { %v453_v13 = vadd.f32 1e-05, %v452_v12 }
 0x148   : > { %1608 = vrsqrt.f32 %v453_v13 }
 0x152   : > { %v1609_v14 = vpop.eup %1608 }
 0x153   : > { %v455_v16 = vmul.f32 %v1609_v14, %v447_v5 }
 0x155   : > { %v462_v18 = vmul.f32 %v1370_v15, %v455_v16 }
 0x157   : > { %v469_v19 = vadd.f32 %v1371_v17, %v462_v18 }
 0x159   : > { %v470_v20 = vpack.c.bf16 %v469_v19, %v469_v19 }
 0x15b   : > { %1452 = vmatmul.mubr.msk.bf16.vlgmr.msra.gmra.mrb[0].mxu0 %vm441_vm0, %v470_v20 }
 0x15c   : > { %1457 = vmatprep.mubr.msk.bf16.mxu0 %vm1693_vm1, %v1692_v9 }
 0x22e   : > { %v531_v22 = vpop.f32.mrb[0].mxu0 }
 0x22f   : > { %v532_v23 = vadd.f32 %v1372_v21, %v531_v22  ;;  %v1453_v24 = vpop.f32.mrb[1].mxu0 }
 0x230   : > { %v534_v25 = vpop.f32.mrb[2].mxu0 }
 0x231   : > { %v1864_v26 = vpack.c.bf16 %v532_v23, %v532_v23  ;;  %v1454_v27 = vpop.f32.mrb[3].mxu0 }
 0x233   : > { %652 = vrot.lane.b32.xlu0 %v1864_v26, %s1694_s16  ;;  %539 = vrot.lane.b32.xlu1 %v1864_v26, %s1695_s20  ;;  %s1702_s16 = smov 56   ;;  %s1703_s20 = smov 48  }
 0x237   : > { %654 = vrot.lane.b32.xlu1 %v1864_v26, %s1696_s21  ;;  %s1704_s21 = smov 40  }
 0x23b   : > { %773 = vrot.lane.b32.xlu1 %v1864_v26, %s1697_s22  ;;  %s1705_s22 = smov 8  }
 0x23f   : > { %771 = vrot.lane.b32.xlu1 %v1864_v26, %s1698_s23 }
 0x243   : > { %892 = vrot.lane.b32.xlu1 %v1864_v26, %s1699_s24 }
 0x247   : > { %890 = vrot.lane.b32.xlu1 %v1864_v26, %s1700_s30  ;;  %s429_s30 = sand.u32 1, %s1682_s26  }
 0x2a5   : > { %v540_v28 = vpop.permute.xlu1 %539  ;;  %v653_v33 = vpop.permute.xlu0 %652 }
 0x2a6   : > { %v546_v29 = vsel %vm541_vm2, %v540_v28, 0 }
 0x2a7   : > { %1456 = vmatpush3.bf16.xpose.msra.mxu0 %v546_v29 }
 0x2a8   : > { %1461 = vmatprep.subr.bf16.mxu0 %v1692_v9 }
 0x2a9   : > { %v655_v30 = vpop.permute.xlu1 %654 }
 0x2aa   : > { %v660_v31 = vsel %vm541_vm2, %v655_v30, 0 }
 0x2ab   : > { %1468 = vmatpush3.bf16.xpose.msra.mxu1 %v660_v31 }
 0x2ac   : > { %1479 = vmatprep.subr.bf16.mxu1 %v1692_v9 }
 0x2ad   : > { %v774_v32 = vpop.permute.xlu1 %773 }
 0x2ae   : > { %1458 = vmatmul.mubr.msk.bf16.vlgmr.msra.gmra.mrb[4].mxu0 %vm541_vm2, %v1864_v26  ;;  %v779_v35 = vsel %vm541_vm2, %v774_v32, 0 }
 0x2af   : > { %1463 = vmatprep.mubr.msk.bf16.mxu0 %vm1693_vm1, %v1692_v9 }
 0x2b1   : > { %v772_v34 = vpop.permute.xlu1 %771 }
 0x2b2   : > { %1470 = vmatmul.mubr.msk.bf16.vlgmr.msra.gmra.mrb[0].mxu1 %vm541_vm2, %v653_v33 }
 0x2b3   : > { %1480 = vmatpush3.bf16.xpose.msra.mxu1 %v779_v35  ;;  %1481 = vmatprep.mubr.msk.bf16.mxu1 %vm1693_vm1, %v1692_v9 }
 0x2b4   : > { %1491 = vmatprep.subr.bf16.mxu1 %v1692_v9 }
 0x2b5   : > { %v893_v36 = vpop.permute.xlu1 %892 }
 0x2b6   : > { %v898_v37 = vsel %vm541_vm2, %v893_v36, 0 }
 0x2b9   : > { %v891_v38 = vpop.permute.xlu1 %890 }
 0x2ba   : > { %1482 = vmatmul.mubr.msk.bf16.vlgmr.msra.gmra.mrb[4].mxu1 %vm541_vm2, %v772_v34 }
 0x2bb   : > { %1492 = vmatpush3.bf16.xpose.msra.mxu1 %v898_v37  ;;  %1493 = vmatprep.mubr.msk.bf16.mxu1 %vm1693_vm1, %v1692_v9 }
 0x2bc   : > { %1503 = vmatprep.subr.bf16.mxu1 %v1692_v9 }
 0x2c2   : > { %1494 = vmatmul.mubr.msk.bf16.vlgmr.msra.gmra.mrb[8].mxu1 %vm541_vm2, %v891_v38 }
 0x2c3   : > { %1507 = vmatprep.mubr.msk.bf16.mxu1 %vm1693_vm1, %v1692_v9 }
 0x381   : > { %v582_v39 = vpop.f32.mrb[4].mxu0 }
 0x382   : > { %v1459_v40 = vpop.f32.mrb[5].mxu0  ;;  %v588_v41 = vsel %vm541_vm2, %v582_v39, -inf }
 0x383   : > { %589 = vmax.xlane.f32.xlu1 %v588_v41  ;;  %v585_v42 = vpop.f32.mrb[6].mxu0 }
 0x384   : > { %v1460_v43 = vpop.f32.mrb[7].mxu0 }
 0x385   : > { %v696_v44 = vpop.f32.mrb[0].mxu1 }
 0x386   : > { %v1471_v45 = vpop.f32.mrb[1].mxu1  ;;  %v702_v46 = vsel %vm541_vm2, %v696_v44, -inf }
 0x387   : > { %703 = vmax.xlane.f32.xlu0 %v702_v46  ;;  %v699_v47 = vpop.f32.mrb[2].mxu1 }
 0x388   : > { %v1472_v48 = vpop.f32.mrb[3].mxu1 }
 0x38d   : > { %v815_v49 = vpop.f32.mrb[4].mxu1 }
 0x38e   : > { %v1483_v50 = vpop.f32.mrb[5].mxu1  ;;  %v821_v51 = vsel %vm541_vm2, %v815_v49, -inf }
 0x38f   : > { %v818_v52 = vpop.f32.mrb[6].mxu1  ;;  %822 = vmax.xlane.f32.xlu1 %v821_v51  ;;  %v1596_v51 = vld [vmem:[%s2049_s3] sm:$0xff]  }
 0x390   : > { %v1484_v53 = vpop.f32.mrb[7].mxu1  ;;  %1504 = vmatpush3.bf16.msra.mxu1 %v1596_v51 }
 0x391   : > { %v1597_v53 = vld [vmem:[%s2049_s3 + $0x8] sm:$0xff]   ;;  %1505 = vmatprep.subr.bf16.mxu1 %v1692_v9 }
 0x394   : > { %1506 = vmatpush3.bf16.msra.mxu1 %v1597_v53 }
 0x395   : > { %v934_v54 = vpop.f32.mrb[8].mxu1  ;;  %1519 = vmatprep.subr.bf16.mxu1 %v1692_v9 }
 0x396   : > { %v1495_v55 = vpop.f32.mrb[9].mxu1  ;;  %v940_v56 = vsel %vm541_vm2, %v934_v54, -inf }
 0x397   : > { %941 = vmax.xlane.f32.xlu0 %v940_v56  ;;  %v937_v57 = vpop.f32.mrb[10].mxu1 }
 0x398   : > { %v1496_v58 = vpop.f32.mrb[11].mxu1 }
 0x410   : > { %v590_v59 = vpop.xlane.xlu1 %589 }
 0x411   : > { %v591_v60 = vsub.f32 %v582_v39, %v590_v59 }
 0x413   : > { %v592_v61 = vmul.f32 1.442695, %v591_v60 }
 0x414   : > { %v704_v62 = vpop.xlane.xlu0 %703 }
 0x415   : > { %1610 = vpow2.f32 %v592_v61  ;;  %v705_v63 = vsub.f32 %v696_v44, %v704_v62 }
 0x417   : > { %v706_v0 = vmul.f32 1.442695, %v705_v63 }
 0x419   : > { %1612 = vpow2.f32 %v706_v0 }
 0x41c   : > { %v823_v12 = vpop.xlane.xlu1 %822 }
 0x41d   : > { %v824_v13 = vsub.f32 %v815_v49, %v823_v12 }
 0x41f   : > { %v1611_v2 = vpop.eup %1610  ;;  %v825_v14 = vmul.f32 1.442695, %v824_v13 }
 0x420   : > { %v594_v3 = vsel %vm541_vm2, %v1611_v2, 0.0 }
 0x421   : > { %595 = vadd.xlane.f32.xlu1 %v594_v3 }
 0x423   : > { %v1613_v4 = vpop.eup %1612 }
 0x424   : > { %v942_v5 = vpop.xlane.xlu0 %941  ;;  %v708_v6 = vsel %vm541_vm2, %v1613_v4, 0.0 }
 0x425   : > { %v943_v7 = vsub.f32 %v934_v54, %v942_v5  ;;  %709 = vadd.xlane.f32.xlu0 %v708_v6  ;;  %v1390_v5 = vld [vmem:[%s2050_s4] ss:$0 sm:$0xff] }
 0x427   : > { %v944_v8 = vmul.f32 1.442695, %v943_v7 }
 0x429   : > { %1614 = vpow2.f32 %v944_v8 }
 0x42a   : > { %1616 = vpow2.f32 %v825_v14 }
 0x432   : > { %600 = vrot.lane.b32.xlu1 %v1864_v26, %s1701_s15  ;;  %s1368_s15 = sshll.u32 %s429_s30, 2 }
 0x433   : > { %v1615_v10 = vpop.eup %1614 }
 0x434   : > { %v946_v11 = vsel %vm541_vm2, %v1615_v10, 0.0  ;;  %v1617_v15 = vpop.eup %1616 }
 0x435   : > { %947 = vadd.xlane.f32.xlu0 %v946_v11  ;;  %v827_v16 = vsel %vm541_vm2, %v1617_v15, 0.0 }
 0x44b   : > { %714 = vrot.lane.b32.xlu0 %v1864_v26, %s1702_s16  ;;  %s1706_s16 = smov 16  }
 0x456   : > { %828 = vadd.xlane.f32.xlu1 %v827_v16 }
 0x467   : > { %833 = vrot.lane.b32.xlu1 %v1864_v26, %s1703_s20  ;;  %s1707_s20 = smov 24  }
 0x46b   : > { %952 = vrot.lane.b32.xlu1 %v1864_v26, %s1704_s21  ;;  %s1407_s21 = sshll.u32 %s1800_s29, 6 }
 0x46c   : > { %s2004_s1 = scalar_lea.hbm %s2059_s13, %s1407_s21 }
 0x4ae   : > { %v596_v17 = vpop.xlane.xlu1 %595 }
 0x4af   : > { %1618 = vrcp.f32 %v596_v17 }
 0x4b2   : > { %v601_v18 = vpop.permute.xlu1 %600  ;;  %v710_v20 = vpop.xlane.xlu0 %709 }
 0x4b3   : > { %v607_v19 = vsel %vm605_vm3, %v601_v18, 0  ;;  %1620 = vrcp.f32 %v710_v20  ;;  %v1599_v18 = vld [vmem:[%s2053_s7 + $0x8] sm:$0xff]  }
 0x4b4   : > { %1462 = vmatpush3.bf16.msra.mxu0 %v607_v19  ;;  %v1600_v19 = vld [vmem:[%s2055_s9] sm:$0xff]   ;;  %v1601_v20 = vld [vmem:[%s2055_s9 + $0x8] sm:$0xff]  }
 0x4b5   : > { %1473 = vmatprep.subr.bf16.mxu0 %v1692_v9 }
 0x4b9   : > { %v1619_v21 = vpop.eup %1618 }
 0x4ba   : > { %v598_v22 = vmul.f32 %v1619_v21, %v1611_v2  ;;  %v1602_v21 = vld [vmem:[%s2055_s9 + $0x10] sm:$0xff]  }
 0x4bc   : > { %v599_v23 = vpack.c.bf16 %v598_v22, %v598_v22  ;;  %v1603_v22 = vld [vmem:[%s2055_s9 + $0x18] sm:$0xff]  }
 0x4bd   : > { %v1621_v24 = vpop.eup %1620 }
 0x4be   : > { %1464 = vmatmul.mubr.msk.bf16.vlgmr.msra.gmra.mrb[8].mxu0 %vm541_vm2, %v599_v23  ;;  %v712_v26 = vmul.f32 %v1621_v24, %v1613_v4  ;;  %v1604_v23 = vld [vmem:[%s2055_s9 + $0x20] sm:$0xff]   ;;  %v1605_v24 = vld [vmem:[%s2055_s9 + $0x28] sm:$0xff]  }
 0x4bf   : > { %1475 = vmatprep.mubr.msk.bf16.mxu0 %vm1693_vm1, %v1692_v9 }
 0x4c0   : > { %v713_v29 = vpack.c.bf16 %v712_v26, %v712_v26 }
 0x4c2   : > { %v948_v25 = vpop.xlane.xlu0 %947 }
 0x4c6   : > { %v715_v27 = vpop.permute.xlu0 %714 }
 0x4c7   : > { %v720_v28 = vsel %vm605_vm3, %v715_v27, 0 }
 0x4c8   : > { %1474 = vmatpush3.bf16.msra.mxu0 %v720_v28 }
 0x4c9   : > { %1485 = vmatprep.subr.bf16.mxu0 %v1692_v9 }
 0x4cb   : > { %1476 = vmatmul.mubr.msk.bf16.vlgmr.msra.gmra.mrb[12].mxu0 %vm541_vm2, %v713_v29  ;;  %v1391_v29 = vld [vmem:[%s2057_s11] ss:$0 sm:$0xff] }
 0x4cc   : > { %1487 = vmatprep.mubr.msk.bf16.mxu0 %vm1693_vm1, %v1692_v9 }
 0x4e3   : > { %v829_v30 = vpop.xlane.xlu1 %828 }
 0x4e4   : > { %1622 = vrcp.f32 %v829_v30 }
 0x4e5   : > { %1624 = vrcp.f32 %v948_v25 }
 0x4e7   : > { %v834_v31 = vpop.permute.xlu1 %833 }
 0x4e8   : > { %v839_v32 = vsel %vm605_vm3, %v834_v31, 0  ;;  %v1392_v31 = vld [vmem:[%s2058_s12] ss:$0 sm:$0xff] }
 0x4e9   : > { %1486 = vmatpush3.bf16.msra.mxu0 %v839_v32 }
 0x4ea   : > { %1497 = vmatprep.subr.bf16.mxu0 %v1692_v9 }
 0x4eb   : > { %v953_v35 = vpop.permute.xlu1 %952 }
 0x4ec   : > { %v958_v38 = vsel %vm605_vm3, %v953_v35, 0  ;;  %v1606_v35 = vld [vmem:[%s2055_s9 + $0x30] sm:$0xff]  }
 0x4ee   : > { %v1623_v33 = vpop.eup %1622 }
 0x4ef   : > { %v831_v34 = vmul.f32 %v1623_v33, %v1617_v15  ;;  %v1625_v37 = vpop.eup %1624 }
 0x4f0   : > { %v950_v39 = vmul.f32 %v1625_v37, %v1615_v10  ;;  %v1393_v37 = vld [vmem:[%s2054_s8] ss:$0 sm:$0xff] }
 0x4f1   : > { %v832_v36 = vpack.c.bf16 %v831_v34, %v831_v34 }
 0x4f2   : > { %v951_v40 = vpack.c.bf16 %v950_v39, %v950_v39 }
 0x4f3   : > { %1488 = vmatmul.mubr.msk.bf16.vlgmr.msra.gmra.mrb[16].mxu0 %vm541_vm2, %v832_v36  ;;  %v1607_v36 = vld [vmem:[%s2055_s9 + $0x38] sm:$0xff]  }
 0x4f4   : > { %1498 = vmatpush3.bf16.msra.mxu0 %v958_v38  ;;  %1499 = vmatprep.mubr.msk.bf16.mxu0 %vm1693_vm1, %v1692_v9 }
 0x4f5   : > { %1511 = vmatprep.subr.bf16.mxu0 %v1692_v9 }
 0x4fb   : > { %1500 = vmatmul.mubr.msk.bf16.vlgmr.msra.gmra.mrb[20].mxu0 %vm541_vm2, %v951_v40 }
 0x4fc   : > { %1515 = vmatprep.mubr.msk.bf16.mxu0 %vm1693_vm1, %v1692_v9 }
 0x591   : > { %v643_v41 = vpop.f32.mrb[8].mxu0 }
 0x592   : > { %v649_v42 = vpack.c.bf16 %v643_v41, %v643_v41  ;;  %v1465_v43 = vpop.f32.mrb[9].mxu0 }
 0x593   : > { %v646_v44 = vpop.f32.mrb[10].mxu0 }
 0x594   : > { %651 = vst.msk [vmem:[#allocation2] sm:$0xf] %vm650_vm4, %v649_v42  ;;  %v1466_v45 = vpop.f32.mrb[11].mxu0 }
 0x59e   : > { %v756_v46 = vpop.f32.mrb[12].mxu0 }
 0x59f   : > { %v1410_v47 = vpack.c.bf16 %v756_v46, %v756_v46  ;;  %v1477_v48 = vpop.f32.mrb[13].mxu0 }
 0x5a0   : > { %v759_v49 = vpop.f32.mrb[14].mxu0 }
 0x5a1   : > { %766 = vrot.lane.b32.xlu0 %v1410_v47, %s1705_s22  ;;  %v1478_v50 = vpop.f32.mrb[15].mxu0  ;;  %s431_s22 = scalar_lea.vmem [#allocation3], %s1368_s15  ;;  %s1708_s15 = smov [#allocation3]  }
 0x5a2   : > { %s1305_s23 = sshll.u32 %s431_s22, 4  ;;  %s2006_s23 = int_to_ptr.vmem [resolvable:$true] %s1305_s23 }
 0x5a3   : > { %s1628_s29 = scalar_lea.vmem %s2006_s23, 64 }
 0x5a4   : > { %p1629_p11 = scmp.ne.s32.totalorder %s2006_s23, %s1628_s29 }
 0x5a6   : > { %p1630_p12 = pnand %p1629_p11, %p1817_p5 }
 0x5a8   : > { %p1631_p13 = pneg %p1630_p12 }
 0x5c6   : > { %v875_v52 = vpop.f32.mrb[16].mxu0 }
 0x5c7   : > { %v1411_v54 = vpack.c.bf16 %v875_v52, %v875_v52  ;;  %v1489_v55 = vpop.f32.mrb[17].mxu0 }
 0x5c8   : > { %v878_v56 = vpop.f32.mrb[18].mxu0 }
 0x5c9   : > { %885 = vrot.lane.b32.xlu1 %v1411_v54, %s1706_s16  ;;  %v1490_v57 = vpop.f32.mrb[19].mxu0  ;;  %s1292_s16 = scalar_lea.sflag [#allocation4], %s429_s30 }
 0x5ce   : > { %v994_v58 = vpop.f32.mrb[20].mxu0 }
 0x5cf   : > { %v1412_v59 = vpack.c.bf16 %v994_v58, %v994_v58  ;;  %v1501_v60 = vpop.f32.mrb[21].mxu0 }
 0x5d0   : > { %v997_v61 = vpop.f32.mrb[22].mxu0 }
 0x5d1   : > { %1004 = vrot.lane.b32.xlu0 %v1412_v59, %s1707_s20  ;;  %v1502_v62 = vpop.f32.mrb[23].mxu0  ;;  %s1632_s20 = sshll.u32 %s1708_s15, 4  ;;  %s1633_s20 = int_to_ptr.vmem [resolvable:$false] %s1632_s20 }
 0x5d2   : > { %s1634_s2 = scalar_lea.vmem %s1633_s20, 128  ;;  %p1635_p0 = scmp.lt.s32.totalorder %s2006_s23, %s1633_s20 }
 0x5d3   : > { %p1636_p1 = scmp.lt.s32.totalorder %s1634_s2, %s1628_s29 }
 0x5d5   : > { %p1637_p2 = por %p1636_p1, %p1635_p0 }
 0x5d7   : > { %p1638_p3 = pnand %p1637_p2, %p1631_p13 }
 0x613   : > { %v767_v63 = vpop.permute.xlu0 %766 }
 0x614   : > { %770 = vst.msk [vmem:[#allocation2] sm:$0xf] %vm769_vm5, %v767_v63 }
 0x63b   : > { %v886_v0 = vpop.permute.xlu1 %885 }
 0x63c   : > { %889 = vst.msk [vmem:[#allocation2] sm:$0xf] %vm888_vm6, %v886_v0 }
 0x643   : > { %v1005_v2 = vpop.permute.xlu0 %1004 }
 0x644   : > { %1008 = vst.msk [vmem:[#allocation2] sm:$0xf] %vm1007_vm7, %v1005_v2 }
 0x64b   : > { %v1009_v3 = vld [vmem:[#allocation2] sm:$0xf] }
 0x64c   : > { %1508 = vmatmul.mubr.msk.bf16.vlgmr.msra.gmra.mrb[12].mxu1 %vm441_vm0, %v1009_v3 }
 0x64d   : > { %1535 = vmatprep.mubr.msk.bf16.mxu1 %vm1693_vm1, %v1692_v9  ;;  %1520 = vmatpush3.bf16.msra.mxu1 %v1600_v19 }
 0x64e   : > { %1521 = vmatprep.subr.bf16.mxu1 %v1692_v9 }
 0x651   : > { %1522 = vmatpush3.bf16.msra.mxu1 %v1601_v20 }
 0x652   : > { %1523 = vmatprep.subr.bf16.mxu1 %v1692_v9 }
 0x655   : > { %1524 = vmatpush3.bf16.msra.mxu1 %v1602_v21 }
 0x656   : > { %1525 = vmatprep.subr.bf16.mxu1 %v1692_v9 }
 0x659   : > { %1526 = vmatpush3.bf16.msra.mxu1 %v1603_v22 }
 0x65a   : > { %1527 = vmatprep.subr.bf16.mxu1 %v1692_v9 }
 0x65d   : > { %1528 = vmatpush3.bf16.msra.mxu1 %v1604_v23 }
 0x65e   : > { %1529 = vmatprep.subr.bf16.mxu1 %v1692_v9 }
 0x661   : > { %1530 = vmatpush3.bf16.msra.mxu1 %v1605_v24 }
 0x662   : > { %1531 = vmatprep.subr.bf16.mxu1 %v1692_v9 }
 0x665   : > { %1532 = vmatpush3.bf16.msra.mxu1 %v1606_v35 }
 0x666   : > { %1533 = vmatprep.subr.bf16.mxu1 %v1692_v9 }
 0x669   : > { %1534 = vmatpush3.bf16.msra.mxu1 %v1607_v36 }
 0x71f   : > { %v1063_v4 = vpop.f32.mrb[12].mxu1 }
 0x720   : > { %v1069_v6 = vadd.f32 %v1063_v4, %v1832_v1  ;;  %v1509_v7 = vpop.f32.mrb[13].mxu1  ;;  %v1598_v1 = vld [vmem:[%s2053_s7] sm:$0xff]  }
 0x721   : > { %v1066_v8 = vpop.f32.mrb[14].mxu1  ;;  %1512 = vmatpush3.bf16.msra.mxu0 %v1598_v1 }
 0x722   : > { %v1941_v10 = vadd.f32 %v1390_v5, %v1069_v6  ;;  %v1510_v11 = vpop.f32.mrb[15].mxu1  ;;  %1513 = vmatprep.subr.bf16.mxu0 %v1692_v9  ;;  %v1397_v9 = vld [vmem:[%s2056_s10] ss:$0 sm:$0xff] }
 0x724   : > { %v1080_v12 = vsel %vm441_vm0, %v1941_v10, 0.0 }
 0x725   : > { %1081 = vadd.xlane.f32.xlu1 %v1080_v12  ;;  %1514 = vmatpush3.bf16.msra.mxu0 %v1599_v18 }
 0x7b2   : > { %v1082_v13 = vpop.xlane.xlu1 %1081 }
 0x7b3   : > { %v1083_v14 = vmul.f32 0.03125, %v1082_v13 }
 0x7b5   : > { %v1084_v15 = vsub.f32 %v1941_v10, %v1083_v14 }
 0x7b7   : > { %v1085_v16 = vmul.f32 %v1084_v15, %v1084_v15 }
 0x7b9   : > { %v1086_v17 = vsel %vm441_vm0, %v1085_v16, 0.0 }
 0x7ba   : > { %1087 = vadd.xlane.f32.xlu0 %v1086_v17 }
 0x847   : > { %v1088_v25 = vpop.xlane.xlu0 %1087 }
 0x848   : > { %v1089_v26 = vmul.f32 0.03125, %v1088_v25 }
 0x84a   : > { %v1090_v27 = vadd.f32 1e-05, %v1089_v26 }
 0x84c   : > { %1626 = vrsqrt.f32 %v1090_v27 }
 0x856   : > { %v1627_v28 = vpop.eup %1626 }
 0x857   : > { %v1092_v30 = vmul.f32 %v1627_v28, %v1084_v15 }
 0x859   : > { %v1099_v32 = vmul.f32 %v1391_v29, %v1092_v30 }
 0x85b   : > { %v1106_v33 = vadd.f32 %v1392_v31, %v1099_v32 }
 0x85d   : > { %v1107_v34 = vpack.c.bf16 %v1106_v33, %v1106_v33 }
 0x85f   : > { %1516 = vmatmul.mubr.msk.bf16.vlgmr.msra.gmra.mrb[24].mxu0 %vm441_vm0, %v1107_v34 }
 0x932   : > { %v1168_v38 = vpop.f32.mrb[24].mxu0 }
 0x933   : > { %v1169_v39 = vadd.f32 %v1393_v37, %v1168_v38  ;;  %v1517_v40 = vpop.f32.mrb[25].mxu0 }
 0x934   : > { %v1171_v41 = vpop.f32.mrb[26].mxu0 }
 0x935   : > { %v1174_v42 = vmax.f32 %v1169_v39, 0.0  ;;  %v1518_v43 = vpop.f32.mrb[27].mxu0 }
 0x937   : > { %v1175_v44 = vpack.c.bf16 %v1174_v42, %v1174_v42 }
 0x939   : > { %1536 = vmatmul.mubr.bf16.vlgmr.msra.gmra.mrb[16].mxu1 %v1175_v44 }
 0xa0c   : > { %v1281_v45 = vpop.f32.mrb[16].mxu1 }
 0xa0d   : > { %v1282_v46 = vadd.f32 %v1397_v9, %v1281_v45  ;;  %v1537_v47 = vpop.f32.mrb[17].mxu1 }
 0xa0e   : > { %v1284_v48 = vpop.f32.mrb[18].mxu1 }
 0xa0f   : > { %v1287_v49 = vadd.f32 %v1282_v46, %v1941_v10  ;;  %v1538_v50 = vpop.f32.mrb[19].mxu1 }
 0xa11   : > { %v1288_v51 = vpack.c.bf16 %v1287_v49, %v1287_v49 }
 0xa13   : > { %1290 = vst.msk [vmem:[%s431_s22] sm:$0xf] %vm1289_vm8, %v1288_v51 }
 0xa14   : > { %1641 = shalt.err (!%p1638_p3)
}
 0xa15   : > { %s1642_s0 = scalar_lea.hbm %s2004_s1, 64  ;;  %s1646_s22 = scalar_lea.hbm %s2059_s13, 128 }
 0xa16   : > { %p1643_p4 = scmp.ne.s32.totalorder %s2004_s1, %s1642_s0  ;;  %p1647_p9 = scmp.lt.u32.totalorder %s2004_s1, %s2059_s13 }
 0xa17   : > { %p1648_p10 = scmp.lt.u32.totalorder %s1646_s22, %s1642_s0  ;;  %p1650_p12 = scmp.lt.u32.totalorder %s1642_s0, %s2004_s1 }
 0xa18   : > { %p1644_p7 = pnand %p1643_p4, %p1817_p5 }
 0xa19   : > { %p1649_p11 = por %p1648_p10, %p1647_p9 }
 0xa1a   : > { %p1645_p8 = pneg %p1644_p7 }
 0xa1b   : > { %p1651_p13 = por %p1650_p12, %p1649_p11 }
 0xa1d   : > { %p1652_p0 = pnand %p1651_p13, %p1645_p8 }
 0xa1f   : > { %1655 = shalt.err (!%p1652_p0)
}
 0xa20   : > { %1539 = dma.vmem_to_hbm [thread:$0]  (%p1817_p5), %s2006_s23, 64, %s2004_s1, %s1292_s16  }
 0xa21 PF: > { %p1545_p1 = scmp.ge.s32.totalorder %s1690_s28, 2  ;;  %s1317_s2 = sand.u32 1, %s1678_s25  }
 0xa22   : > { %s1318_s29 = scalar_lea.sflag [#allocation4], %s1317_s2 }
 0xa23   : > { %p1542_p2 = pnand %p1545_p1, %p1821_p6 }
 0xa25   : > { %1673 = dma.done.wait (!%p1542_p2), %s1318_s29, 64  }
 0xa26   : > { %1675 = vsyncadd (!%p1542_p2), %s1318_s29, 4294967232  ;;  %p23_p3 = scmp.ge.s32.totalorder %s1804_s14, 4   ;;  %s2068_s25 = smov %s1682_s26 }
 0xa27   : > { %s2069_s26 = smov %s1686_s27  ;;  %s2070_s27 = smov %s1815_s17 }
 0xa28   : > { %s2071_s28 = smov %s1804_s14  ;;  %25 = sbr.rel (!%p23_p3) target bundleno = 7 (0x7), region = 107 }
 0xa2f   :  { %1323 = vsyncpa [#allocation4], 1 }
 0xa30   :  { %1325 = vsyncpa [#allocation4 + $0x1], 1 }

</bundles_post_ra>
